<compile_context>
chip_gen: v6e
topology: v6e:2x2x1
jax: 0.10.0
libtpu: 0.0.40
codegen_flags: <defaults>
</compile_context>

<pallas_src>
import jax
import jax.numpy as jnp
from jax.experimental import pallas as pl
from jax.experimental.pallas import tpu as pltpu

_BIG = 1e30  # padded kernel columns: exp(-_BIG) == 0.0 exactly in f32


def rbf_kernel(x_ref, ct_ref, c2_ref, neg_eps2_ref, wt_ref, o_ref):
    x = x_ref[...]                # (TB, Fin)     f32  (batch tile)
    c_t = ct_ref[...]             # (Fin, Np)     f32  (resident)
    c2 = c2_ref[...]              # (1, Np)       f32  (resident, +BIG on pads)
    neg_eps2 = neg_eps2_ref[...]  # (1, Np)       f32  (resident, -1 on pads)
    w_t = wt_ref[...]             # (Np, Fout_p)  bf16 (resident)

    # Squared L2 distance via ||x||^2 + ||c||^2 - 2 x.c  (f32 MXU matmul).
    x2 = jnp.sum(x * x, axis=-1, keepdims=True)                    # (TB, 1)
    xc = jnp.dot(x, c_t, preferred_element_type=jnp.float32)       # (TB, Np)
    r2 = jnp.maximum(x2 + c2 - 2.0 * xc, 0.0)

    # Gaussian RBF, sqrt-free: exp(-(eps*r)^2) == exp(-eps^2 * r^2).
    rbfs = jnp.exp(neg_eps2 * r2)                                  # (TB, Np)

    # Normalization trick; padded columns contribute exactly 0 to the sum.
    denom = 1e-9 + jnp.sum(rbfs, axis=-1, keepdims=True)           # (TB, 1)
    rbfs = rbfs * pl.reciprocal(denom, approx=True)

    # Linear combination with the weights (bf16 MXU matmul, f32 accumulate).
    o_ref[...] = jnp.dot(rbfs.astype(jnp.bfloat16), w_t,
                         preferred_element_type=jnp.float32)


def _round_up(x, m):
    return (x + m - 1) // m * m


def _pick_batch_tile(batch, fin, n_p, fout_p, budget_bytes=24 * 1024 * 1024):
    """Largest 128-multiple batch tile fitting a conservative VMEM budget."""
    resident = (fin * n_p + 2 * n_p) * 4 + n_p * fout_p * 2
    for tb in (1024, 512, 256, 128):
        # 2x double-buffered x / out tiles + ~4 live (TB, Np) f32 temporaries.
        per_tile = 2 * tb * fin * 4 + 2 * tb * fout_p * 4 + 4 * tb * n_p * 4
        if resident + per_tile <= budget_bytes and (batch >= tb or tb == 128):
            return tb
    return 128


@jax.jit
def rbf_layer_forward(x, centers, log_shapes, weights):
    """x: (B, Fin); centers: (N, Fin); log_shapes: (N,); weights: (Fout, N)."""
    B, Fin = x.shape
    N, _ = centers.shape
    Fout = weights.shape[0]

    n_p = _round_up(N, 128)
    fout_p = _round_up(Fout, 128)
    tb = _pick_batch_tile(B, Fin, n_p, fout_p)
    b_p = _round_up(B, tb)
    grid = (b_p // tb,)

    # ---- parameter prep (wrapper-side plumbing, grid-invariant) -----------
    x_p = jnp.zeros((b_p, Fin), jnp.float32).at[:B].set(x.astype(jnp.float32))

    c_t = jnp.zeros((Fin, n_p), jnp.float32).at[:, :N].set(
        centers.astype(jnp.float32).T)
    c2 = jnp.sum(c_t * c_t, axis=0, keepdims=True)                  # (1, Np)
    col = jax.lax.broadcasted_iota(jnp.int32, (1, n_p), 1)
    c2 = jnp.where(col < N, c2, _BIG)                               # kill pads
    neg_eps2 = jnp.full((1, n_p), -1.0, jnp.float32).at[:, :N].set(
        -jnp.exp(2.0 * log_shapes.astype(jnp.float32))[None, :])

    w_t = jnp.zeros((n_p, fout_p), jnp.bfloat16).at[:N, :Fout].set(
        weights.astype(jnp.bfloat16).T)

    flops = 2 * b_p * n_p * Fin + 2 * b_p * n_p * fout_p + 8 * b_p * n_p
    bytes_accessed = ((b_p * Fin + Fin * n_p + 2 * n_p + b_p * fout_p) * 4
                      + n_p * fout_p * 2)

    out_p = pl.pallas_call(
        rbf_kernel,
        out_shape=jax.ShapeDtypeStruct((b_p, fout_p), jnp.float32),
        grid_spec=pltpu.PrefetchScalarGridSpec(
            num_scalar_prefetch=0,
            grid=grid,
            in_specs=[
                pl.BlockSpec((tb, Fin), lambda i: (i, 0)),       # x (tiled B)
                pl.BlockSpec((Fin, n_p), lambda i: (0, 0)),      # c_t resident
                pl.BlockSpec((1, n_p), lambda i: (0, 0)),        # ||c||^2
                pl.BlockSpec((1, n_p), lambda i: (0, 0)),        # -eps^2
                pl.BlockSpec((n_p, fout_p), lambda i: (0, 0)),   # w_t resident
            ],
            out_specs=pl.BlockSpec((tb, fout_p), lambda i: (i, 0)),
        ),
        compiler_params=pltpu.CompilerParams(
            dimension_semantics=("parallel",),   # megacore-shard batch (v7x)
            vmem_limit_bytes=48 * 1024 * 1024,
        ),
        cost_estimate=pl.CostEstimate(
            flops=flops,
            transcendentals=b_p * n_p,
            bytes_accessed=bytes_accessed,
        ),
    )(x_p, c_t, c2, neg_eps2, w_t)

    return out_p[:B, :Fout]


def rbf_layer_reference(x, centers, log_shapes, weights):
    """Pure-JAX mirror of the PyTorch forward (L2 norm, Gaussian phi, f32)."""
    diff = x[:, None, :] - centers[None, :, :]            # (B, N, Fin)
    r = jnp.sqrt(jnp.sum(diff * diff, axis=-1))           # (B, N)
    eps_r = jnp.exp(log_shapes)[None, :] * r
    rbfs = jnp.exp(-(eps_r ** 2))
    rbfs = rbfs / (1e-9 + jnp.sum(rbfs, axis=-1, keepdims=True))
    return jnp.sum(weights[None, :, :] * rbfs[:, None, :], axis=-1)


if __name__ == "__main__":
    # Small shapes consistent with the module: input (B, Fin) -> output (B, Fout).
    B, Fin, N, Fout = 8, 32, 64, 16

    key = jax.random.PRNGKey(0)
    k_x, k_c, k_s, k_w, k_x2 = jax.random.split(key, 5)

    # Deterministic parameter init mirroring RBFLayer.reset():
    #   centers ~ U(-1, 1), log_shapes ~ N(0, 0.1), weights ~ xavier_uniform.
    x = jax.random.normal(k_x, (B, Fin), dtype=jnp.float32)
    centers = jax.random.uniform(k_c, (N, Fin), minval=-1.0, maxval=1.0,
                                 dtype=jnp.float32)
    log_shapes = 0.1 * jax.random.normal(k_s, (N,), dtype=jnp.float32)
    xavier_bound = (6.0 / (N + Fout)) ** 0.5
    weights = jax.random.uniform(k_w, (Fout, N), minval=-xavier_bound,
                                 maxval=xavier_bound, dtype=jnp.float32)

    out = rbf_layer_forward(x, centers, log_shapes, weights)
    out = jax.block_until_ready(out)
    ref = rbf_layer_reference(x, centers, log_shapes, weights)
    assert out.shape == (B, Fout)
    # Tolerance loosened vs. pure-f32 because the rbfs @ w_t matmul runs with
    # bf16 inputs and the normalization uses the approx EUP reciprocal.
    assert jnp.allclose(out, ref, atol=1e-2, rtol=1e-2), "mismatch vs reference"

    # Second check: a batch that exercises multiple grid steps + row padding.
    B2 = 300
    x2 = jax.random.normal(k_x2, (B2, Fin), dtype=jnp.float32)
    out2 = jax.block_until_ready(
        rbf_layer_forward(x2, centers, log_shapes, weights))
    ref2 = rbf_layer_reference(x2, centers, log_shapes, weights)
    assert out2.shape == (B2, Fout)
    assert jnp.allclose(out2, ref2, atol=1e-2, rtol=1e-2), "mismatch (tiled)"

    print("KERNEL_OK")
</pallas_src>

<mosaic_0001>
module attributes {stable_mosaic.version = 11 : i64} {
  func.func @rbf_kernel(%arg0: i32, %arg1: memref<128x32xf32, #tpu.memory_space<vmem>>, %arg2: memref<32x128xf32, #tpu.memory_space<vmem>>, %arg3: memref<1x128xf32, #tpu.memory_space<vmem>>, %arg4: memref<1x128xf32, #tpu.memory_space<vmem>>, %arg5: memref<128x128xbf16, #tpu.memory_space<vmem>>, %arg6: memref<128x128xf32, #tpu.memory_space<vmem>>) attributes {dimension_semantics = [#tpu.dimension_semantics<parallel>], iteration_bounds = array<i64: 1>, scalar_prefetch = 0 : i64, scratch_operands = 0 : i64, tpu.core_type = #tpu.core_type<tc>, window_params = [{transform_indices = @transform_0, window_bounds = array<i64: 128, 32>}, {pipeline_mode = #tpu.pipeline_mode<synchronous>, transform_indices = @transform_1, window_bounds = array<i64: 32, 128>}, {pipeline_mode = #tpu.pipeline_mode<synchronous>, transform_indices = @transform_2, window_bounds = array<i64: 1, 128>}, {pipeline_mode = #tpu.pipeline_mode<synchronous>, transform_indices = @transform_3, window_bounds = array<i64: 1, 128>}, {pipeline_mode = #tpu.pipeline_mode<synchronous>, transform_indices = @transform_4, window_bounds = array<i64: 128, 128>}, {transform_indices = @transform_5, window_bounds = array<i64: 128, 128>}]} {
    %c0 = arith.constant 0 : index
    %c0_0 = arith.constant 0 : index
    %0 = vector.load %arg1[%c0, %c0_0] : memref<128x32xf32, #tpu.memory_space<vmem>>, vector<128x32xf32>
    %c0_1 = arith.constant 0 : index
    %c0_2 = arith.constant 0 : index
    %1 = vector.load %arg2[%c0_1, %c0_2] : memref<32x128xf32, #tpu.memory_space<vmem>>, vector<32x128xf32>
    %c0_3 = arith.constant 0 : index
    %c0_4 = arith.constant 0 : index
    %2 = vector.load %arg3[%c0_3, %c0_4] : memref<1x128xf32, #tpu.memory_space<vmem>>, vector<1x128xf32>
    %c0_5 = arith.constant 0 : index
    %c0_6 = arith.constant 0 : index
    %3 = vector.load %arg4[%c0_5, %c0_6] : memref<1x128xf32, #tpu.memory_space<vmem>>, vector<1x128xf32>
    %c0_7 = arith.constant 0 : index
    %c0_8 = arith.constant 0 : index
    %4 = vector.load %arg5[%c0_7, %c0_8] : memref<128x128xbf16, #tpu.memory_space<vmem>>, vector<128x128xbf16>
    %5 = arith.mulf %0, %0 : vector<128x32xf32>
    %cst = arith.constant dense<0.000000e+00> : vector<128xf32>
    %6 = vector.multi_reduction <add>, %5, %cst [1] : vector<128x32xf32> to vector<128xf32>
    %7 = vector.shape_cast %6 : vector<128xf32> to vector<128x1xf32>
    %cst_9 = arith.constant dense<0.000000e+00> : vector<128x128xf32>
    %8 = tpu.matmul %0, %1, %cst_9 {dimension_numbers = #tpu.dot_dimension_numbers<[1], [0], [0], [1], [0, 0, 1, 1], [], []>} : vector<128x32xf32>, vector<32x128xf32>, vector<128x128xf32> -> vector<128x128xf32>
    %9 = vector.broadcast %7 : vector<128x1xf32> to vector<128x128xf32>
    %10 = vector.broadcast %2 : vector<1x128xf32> to vector<128x128xf32>
    %11 = arith.addf %9, %10 : vector<128x128xf32>
    %cst_10 = arith.constant 2.000000e+00 : f32
    %12 = vector.broadcast %cst_10 : f32 to vector<128x128xf32>
    %13 = arith.mulf %12, %8 : vector<128x128xf32>
    %14 = arith.subf %11, %13 : vector<128x128xf32>
    %cst_11 = arith.constant 0.000000e+00 : f32
    %15 = vector.broadcast %cst_11 : f32 to vector<128x128xf32>
    %16 = arith.maximumf %14, %15 : vector<128x128xf32>
    %17 = vector.broadcast %3 : vector<1x128xf32> to vector<128x128xf32>
    %18 = arith.mulf %17, %16 : vector<128x128xf32>
    %19 = math.exp %18 : vector<128x128xf32>
    %cst_12 = arith.constant dense<0.000000e+00> : vector<128xf32>
    %20 = vector.multi_reduction <add>, %19, %cst_12 [1] : vector<128x128xf32> to vector<128xf32>
    %21 = vector.shape_cast %20 : vector<128xf32> to vector<128x1xf32>
    %cst_13 = arith.constant 9.99999971E-10 : f32
    %22 = vector.broadcast %cst_13 : f32 to vector<128x1xf32>
    %23 = arith.addf %22, %21 : vector<128x1xf32>
    %24 = tpu.reciprocal %23 {approx = true} : vector<128x1xf32> -> vector<128x1xf32>
    %25 = vector.broadcast %24 : vector<128x1xf32> to vector<128x128xf32>
    %26 = arith.mulf %19, %25 : vector<128x128xf32>
    %27 = arith.truncf %26 : vector<128x128xf32> to vector<128x128xbf16>
    %cst_14 = arith.constant dense<0.000000e+00> : vector<128x128xf32>
    %28 = tpu.matmul %27, %4, %cst_14 {dimension_numbers = #tpu.dot_dimension_numbers<[1], [0], [0], [1], [0, 0, 1, 1], [], []>} : vector<128x128xbf16>, vector<128x128xbf16>, vector<128x128xf32> -> vector<128x128xf32>
    %c0_15 = arith.constant 0 : index
    %c0_16 = arith.constant 0 : index
    %29 = vector.load %arg6[%c0_15, %c0_16] : memref<128x128xf32, #tpu.memory_space<vmem>>, vector<128x128xf32>
    tpu.vector_store %arg6[%c0_15, %c0_16], %28 {strides = array<i32>} : memref<128x128xf32, #tpu.memory_space<vmem>>, vector<128x128xf32>,
    return
  }
  func.func @transform_0(%arg0: i32) -> (i32, i32) {
    %c0_i32 = arith.constant 0 : i32
    %c0_i32_0 = arith.constant 0 : i32
    return %arg0, %c0_i32 : i32, i32
  }
  func.func @transform_1(%arg0: i32) -> (i32, i32) {
    %c0_i32 = arith.constant 0 : i32
    %c0_i32_0 = arith.constant 0 : i32
    %c0_i32_1 = arith.constant 0 : i32
    return %c0_i32, %c0_i32_0 : i32, i32
  }
  func.func @transform_2(%arg0: i32) -> (i32, i32) {
    %c0_i32 = arith.constant 0 : i32
    %c0_i32_0 = arith.constant 0 : i32
    %c0_i32_1 = arith.constant 0 : i32
    return %c0_i32, %c0_i32_0 : i32, i32
  }
  func.func @transform_3(%arg0: i32) -> (i32, i32) {
    %c0_i32 = arith.constant 0 : i32
    %c0_i32_0 = arith.constant 0 : i32
    %c0_i32_1 = arith.constant 0 : i32
    return %c0_i32, %c0_i32_0 : i32, i32
  }
  func.func @transform_4(%arg0: i32) -> (i32, i32) {
    %c0_i32 = arith.constant 0 : i32
    %c0_i32_0 = arith.constant 0 : i32
    %c0_i32_1 = arith.constant 0 : i32
    return %c0_i32, %c0_i32_0 : i32, i32
  }
  func.func @transform_5(%arg0: i32) -> (i32, i32) {
    %c0_i32 = arith.constant 0 : i32
    %c0_i32_0 = arith.constant 0 : i32
    return %arg0, %c0_i32 : i32, i32
  }
}

</mosaic_0001>

<bundles_post_ra>
// kernel: rbf_layer_forward.1
= control target key start
LH: loop header
LB: loop body
LE: loop exit
PB: predicated region body
PF: predicated region fallthrough
CT: control target
= control target key end

     0   :  { %vm75_vm0 = vcmask 261120   ;;  %s1223_s1 = inlined_call_operand.vmem [shape: f32[32,128], index: 1, kind: input, shape index: {}]   ;;  %s1224_s0 = inlined_call_operand.vmem [shape: f32[128,32], index: 0, kind: input, shape index: {}]   ;;  %s1225_s4 = inlined_call_operand.vmem [shape: bf16[128,128], index: 4, kind: input, shape index: {}]   ;;  %s1226_s2 = inlined_call_operand.vmem [shape: f32[1,128], index: 2, kind: input, shape index: {}]   ;;  %s1227_s3 = inlined_call_operand.vmem [shape: f32[1,128], index: 3, kind: input, shape index: {}]   ;;  %s1228_s5 = inlined_call_operand.vmem [shape: f32[128,128], index: 5, kind: output, shape index: {}]  }
   0x1   :  { %v40_v0 = vld [vmem:[%s1223_s1 + $0x18] sm:$0xff]  ;;  %v39_v1 = vld [vmem:[%s1223_s1 + $0x10] sm:$0xff]  ;;  %v21_v2 = vld [vmem:[%s1224_s0] sm:$0xff] }
   0x2   :  { %756 = vmatprep.subr.mxu0 %v40_v0  ;;  %v38_v3 = vld [vmem:[%s1223_s1 + $0x8] sm:$0xff]  ;;  %764 = vmatprep.mubr.msk.f32.mxu0 %vm75_vm0, %v21_v2  ;;  %v25_v4 = vld [vmem:[%s1224_s0 + $0x20] sm:$0xff]  ;;  %v27_v6 = vld [vmem:[%s1224_s0 + $0x30] sm:$0xff]  ;;  %v59_v30 = vmul.f32 %v21_v2, %v21_v2 }
   0x3   :  { %757 = vmatpush3.msra.mxu0 %v40_v0  ;;  %v26_v5 = vld [vmem:[%s1224_s0 + $0x28] sm:$0xff]  ;;  %v28_v7 = vld [vmem:[%s1224_s0 + $0x38] sm:$0xff]  ;;  %v63_v8 = vmul.f32 %v25_v4, %v25_v4  ;;  %v37_v9 = vld [vmem:[%s1223_s1] sm:$0xff]  ;;  %v65_v10 = vmul.f32 %v27_v6, %v27_v6 }
   0x4   :  { %758 = vmatprep.subr.mxu0 %v39_v1  ;;  %v66_v11 = vmul.f32 %v28_v7, %v28_v7  ;;  %v64_v12 = vmul.f32 %v26_v5, %v26_v5  ;;  %v22_v14 = vld [vmem:[%s1224_s0 + $0x8] sm:$0xff]  ;;  %v29_v15 = vld [vmem:[%s1224_s0 + $0x40] sm:$0xff]  ;;  %v23_v17 = vld [vmem:[%s1224_s0 + $0x10] sm:$0xff]  ;;  %v76_v36 = vsel %vm75_vm0, %v59_v30, 0.0 }
   0x5   :  { %759 = vmatpush3.msra.mxu0 %v39_v1  ;;  %v88_v13 = vsel %vm75_vm0, %v63_v8, 0.0  ;;  %v94_v16 = vsel %vm75_vm0, %v65_v10, 0.0  ;;  %v30_v18 = vld [vmem:[%s1224_s0 + $0x48] sm:$0xff]  ;;  %v67_v20 = vmul.f32 %v29_v15, %v29_v15  ;;  %v24_v23 = vld [vmem:[%s1224_s0 + $0x18] sm:$0xff]  ;;  %v31_v24 = vld [vmem:[%s1224_s0 + $0x50] sm:$0xff]  ;;  %v60_v33 = vmul.f32 %v22_v14, %v22_v14 }
   0x6   :  { %760 = vmatprep.subr.mxu0 %v38_v3  ;;  %89 = vadd.xlane.f32.xlu0 %v88_v13  ;;  %v91_v19 = vsel %vm75_vm0, %v64_v12, 0.0  ;;  %v97_v21 = vsel %vm75_vm0, %v66_v11, 0.0  ;;  %v68_v22 = vmul.f32 %v30_v18, %v30_v18  ;;  %v32_v25 = vld [vmem:[%s1224_s0 + $0x58] sm:$0xff]  ;;  %v69_v27 = vmul.f32 %v31_v24, %v31_v24  ;;  %v33_v34 = vld [vmem:[%s1224_s0 + $0x60] sm:$0xff]  ;;  %v34_v35 = vld [vmem:[%s1224_s0 + $0x68] sm:$0xff] }
   0x7   :  { %761 = vmatpush3.msra.mxu0 %v38_v3  ;;  %95 = vadd.xlane.f32.xlu1 %v94_v16  ;;  %v100_v26 = vsel %vm75_vm0, %v67_v20, 0.0  ;;  %v70_v29 = vmul.f32 %v32_v25, %v32_v25  ;;  %v71_v37 = vmul.f32 %v33_v34, %v33_v34  ;;  %v79_v38 = vsel %vm75_vm0, %v60_v33, 0.0  ;;  %v35_v44 = vld [vmem:[%s1224_s0 + $0x70] sm:$0xff]  ;;  %v36_v45 = vld [vmem:[%s1224_s0 + $0x78] sm:$0xff]  ;;  %v1049_v2 = vld [vmem:[%s1226_s2] ss:$0 sm:$0xff] }
   0x8   :  { %762 = vmatprep.subr.mxu0 %v37_v9  ;;  %v103_v28 = vsel %vm75_vm0, %v68_v22, 0.0  ;;  %v106_v31 = vsel %vm75_vm0, %v69_v27, 0.0  ;;  %v72_v39 = vmul.f32 %v34_v35, %v34_v35  ;;  %v61_v41 = vmul.f32 %v23_v17, %v23_v17  ;;  %v836_v52 = vld [vmem:[%s1225_s4 + $0x38] sm:$0xff]   ;;  %v837_v53 = vld [vmem:[%s1225_s4 + $0x30] sm:$0xff]   ;;  %v1057_v13 = vld [vmem:[%s1227_s3] ss:$0 sm:$0xff] }
   0x9   :  { %763 = vmatpush3.msra.mxu0 %v37_v9  ;;  %v109_v32 = vsel %vm75_vm0, %v70_v29, 0.0  ;;  %v112_v40 = vsel %vm75_vm0, %v71_v37, 0.0  ;;  %v62_v43 = vmul.f32 %v24_v23, %v24_v23  ;;  %v73_v47 = vmul.f32 %v35_v44, %v35_v44  ;;  %820 = vmatprep.subr.bf16.mxu1 %v836_v52 }
   0xa   :  { %765 = vmatmul.mubr.msk.f32.vlgmr.msra.gmra.mxu0 %vm75_vm0, %v22_v14  ;;  %92 = vadd.xlane.f32.xlu0 %v91_v19  ;;  %v115_v42 = vsel %vm75_vm0, %v72_v39, 0.0  ;;  %v82_v46 = vsel %vm75_vm0, %v61_v41, 0.0  ;;  %v74_v49 = vmul.f32 %v36_v45, %v36_v45 }
   0xb   :  { %767 = vmatprep.mubr.msk.f32.mxu0 %vm75_vm0, %v23_v17  ;;  %98 = vadd.xlane.f32.xlu1 %v97_v21  ;;  %v85_v48 = vsel %vm75_vm0, %v62_v43, 0.0  ;;  %v118_v50 = vsel %vm75_vm0, %v73_v47, 0.0 }
   0xc   :  { %v121_v51 = vsel %vm75_vm0, %v74_v49, 0.0  ;;  %788 = vmatprep.subr.bf16.mxu0 %v836_v52  ;;  %828 = vmatpush3.bf16.msra.mxu1 %v836_v52 }
   0xd   :  { %789 = vmatpush3.bf16.msra.mxu0 %v836_v52  ;;  %821 = vmatprep.subr.bf16.mxu1 %v837_v53 }
   0xe   :  { %768 = vmatmul.mubr.msk.f32.gmra.mxu0 %vm75_vm0, %v24_v23  ;;  %101 = vadd.xlane.f32.xlu0 %v100_v26 }
   0xf   :  { %770 = vmatprep.mubr.msk.f32.mxu0 %vm75_vm0, %v25_v4  ;;  %104 = vadd.xlane.f32.xlu1 %v103_v28 }
  0x10   :  { %790 = vmatprep.subr.bf16.mxu0 %v837_v53  ;;  %829 = vmatpush3.bf16.msra.mxu1 %v837_v53 }
  0x11   :  { %791 = vmatpush3.bf16.msra.mxu0 %v837_v53 }
  0x12   :  { %771 = vmatmul.mubr.msk.f32.gmra.mxu0 %vm75_vm0, %v26_v5  ;;  %107 = vadd.xlane.f32.xlu0 %v106_v31 }
  0x13   :  { %773 = vmatprep.mubr.msk.f32.mxu0 %vm75_vm0, %v27_v6  ;;  %110 = vadd.xlane.f32.xlu1 %v109_v32 }
  0x16   :  { %774 = vmatmul.mubr.msk.f32.gmra.mxu0 %vm75_vm0, %v28_v7  ;;  %77 = vadd.xlane.f32.xlu0 %v76_v36 }
  0x17   :  { %776 = vmatprep.mubr.msk.f32.mxu0 %vm75_vm0, %v29_v15  ;;  %80 = vadd.xlane.f32.xlu1 %v79_v38 }
  0x1a   :  { %777 = vmatmul.mubr.msk.f32.gmra.mxu0 %vm75_vm0, %v30_v18  ;;  %113 = vadd.xlane.f32.xlu0 %v112_v40 }
  0x1b   :  { %779 = vmatprep.mubr.msk.f32.mxu0 %vm75_vm0, %v31_v24  ;;  %116 = vadd.xlane.f32.xlu1 %v115_v42 }
  0x1e   :  { %780 = vmatmul.mubr.msk.f32.gmra.mxu0 %vm75_vm0, %v32_v25  ;;  %83 = vadd.xlane.f32.xlu0 %v82_v46 }
  0x1f   :  { %782 = vmatprep.mubr.msk.f32.mxu0 %vm75_vm0, %v33_v34  ;;  %86 = vadd.xlane.f32.xlu1 %v85_v48 }
  0x22   :  { %783 = vmatmul.mubr.msk.f32.gmra.mxu0 %vm75_vm0, %v34_v35  ;;  %119 = vadd.xlane.f32.xlu0 %v118_v50 }
  0x23   :  { %785 = vmatprep.mubr.msk.f32.mxu0 %vm75_vm0, %v35_v44  ;;  %122 = vadd.xlane.f32.xlu1 %v121_v51 }
  0x26   :  { %786 = vmatmul.mubr.msk.f32.gmra.mxu0 %vm75_vm0, %v36_v45 }
  0x8f   :  { %v90_v55 = vpop.xlane.xlu0 %89 }
  0x90   :  { %v96_v54 = vpop.xlane.xlu1 %95  ;;  %v327_v35 = vadd.f32 %v1049_v2, %v90_v55 }
  0x91   :  { %v329_v43 = vadd.f32 %v1049_v2, %v96_v54 }
  0x93   :  { %v93_v57 = vpop.xlane.xlu0 %92 }
  0x94   :  { %v99_v56 = vpop.xlane.xlu1 %98  ;;  %v328_v29 = vadd.f32 %v1049_v2, %v93_v57 }
  0x95   :  { %v330_v36 = vadd.f32 %v1049_v2, %v99_v56 }
  0x97   :  { %v1036_v59 = vpop.xlane.xlu0 %101 }
  0x98   :  { %v105_v58 = vpop.xlane.xlu1 %104  ;;  %v331_v54 = vadd.f32 %v1049_v2, %v1036_v59 }
  0x99   :  { %v332_v50 = vadd.f32 %v1049_v2, %v105_v58 }
  0x9b   :  { %v1040_v61 = vpop.xlane.xlu0 %107 }
  0x9c   :  { %v1038_v60 = vpop.xlane.xlu1 %110 }
  0x9d   :  { %v334_v59 = vadd.f32 %v1049_v2, %v1038_v60 }
  0x9f   :  { %v78_v63 = vpop.xlane.xlu0 %77 }
  0xa0   :  { %v81_v62 = vpop.xlane.xlu1 %80  ;;  %v323_v9 = vadd.f32 %v1049_v2, %v78_v63 }
  0xa1   :  { %v324_v5 = vadd.f32 %v1049_v2, %v81_v62 }
  0xa3   :  { %v1044_v1 = vpop.xlane.xlu0 %113 }
  0xa4   :  { %v1042_v0 = vpop.xlane.xlu1 %116 }
  0xa7   :  { %v84_v8 = vpop.xlane.xlu0 %83 }
  0xa8   :  { %v87_v4 = vpop.xlane.xlu1 %86  ;;  %v325_v18 = vadd.f32 %v1049_v2, %v84_v8 }
  0xa9   :  { %v326_v12 = vadd.f32 %v1049_v2, %v87_v4 }
  0xca   :  { %v766_v3 = vpop.f32.mrf.mxu0 }
  0xcb   :  { %v340_v6 = vmul.f32 2.0, %v766_v3 }
  0xcc   :  { %v238_v7 = vpop.f32.mrf.mxu0 }
  0xcd   :  { %v356_v10 = vsub.f32 %v324_v5, %v340_v6  ;;  %v339_v11 = vmul.f32 2.0, %v238_v7 }
  0xce   :  { %v769_v14 = vpop.f32.mrf.mxu0 }
  0xcf   :  { %v372_v15 = vmax.f32 %v356_v10, 0.0  ;;  %v355_v16 = vsub.f32 %v323_v9, %v339_v11  ;;  %v342_v17 = vmul.f32 2.0, %v769_v14 }
  0xd0   :  { %v248_v19 = vpop.f32.mrf.mxu0 }
  0xd1   :  { %v394_v20 = vmul.f32 %v1057_v13, %v372_v15  ;;  %v371_v21 = vmax.f32 %v355_v16, 0.0  ;;  %v358_v22 = vsub.f32 %v326_v12, %v342_v17  ;;  %v341_v23 = vmul.f32 2.0, %v248_v19  ;;  %v123_v19 = vpop.xlane.xlu1 %122 }
  0xd2   :  { %v772_v24 = vpop.f32.mrf.mxu0 }
  0xd3   :  { %v411_v25 = vmul.f32 1.442695, %v394_v20  ;;  %v393_v26 = vmul.f32 %v1057_v13, %v371_v21  ;;  %v374_v27 = vmax.f32 %v358_v22, 0.0  ;;  %v357_v28 = vsub.f32 %v325_v18, %v341_v23 }
  0xd4   :  { %v344_v30 = vmul.f32 2.0, %v772_v24  ;;  %v258_v31 = vpop.f32.mrf.mxu0  ;;  %v333_v21 = vadd.f32 %v1049_v2, %v1040_v61  ;;  %v336_v22 = vadd.f32 %v1049_v2, %v1042_v0  ;;  %v338_v0 = vadd.f32 %v1049_v2, %v123_v19  ;;  %v843_v19 = vld [vmem:[%s1225_s4] sm:$0xff]  }
  0xd5   :  { %844 = vpow2.f32 %v411_v25  ;;  %v409_v32 = vmul.f32 1.442695, %v393_v26  ;;  %v396_v33 = vmul.f32 %v1057_v13, %v374_v27  ;;  %v373_v34 = vmax.f32 %v357_v28, 0.0  ;;  %v120_v28 = vpop.xlane.xlu0 %119 }
  0xd6   :  { %v360_v37 = vsub.f32 %v328_v29, %v344_v30  ;;  %v343_v38 = vmul.f32 2.0, %v258_v31  ;;  %v775_v39 = vpop.f32.mrf.mxu0  ;;  %v335_v30 = vadd.f32 %v1049_v2, %v1044_v1 }
  0xd7   :  { %846 = vpow2.f32 %v409_v32  ;;  %v415_v40 = vmul.f32 1.442695, %v396_v33  ;;  %v395_v41 = vmul.f32 %v1057_v13, %v373_v34  ;;  %v346_v42 = vmul.f32 2.0, %v775_v39 }
  0xd8   :  { %v376_v44 = vmax.f32 %v360_v37, 0.0  ;;  %v359_v45 = vsub.f32 %v327_v35, %v343_v38  ;;  %v268_v46 = vpop.f32.mrf.mxu0 }
  0xd9   :  { %848 = vpow2.f32 %v415_v40  ;;  %v413_v47 = vmul.f32 1.442695, %v395_v41  ;;  %v362_v48 = vsub.f32 %v330_v36, %v346_v42  ;;  %v345_v49 = vmul.f32 2.0, %v268_v46 }
  0xda   :  { %v398_v51 = vmul.f32 %v1057_v13, %v376_v44  ;;  %v375_v52 = vmax.f32 %v359_v45, 0.0  ;;  %v778_v53 = vpop.f32.mrf.mxu0  ;;  %v337_v40 = vadd.f32 %v1049_v2, %v120_v28 }
  0xdb   :  { %850 = vpow2.f32 %v413_v47  ;;  %v378_v55 = vmax.f32 %v362_v48, 0.0  ;;  %v361_v56 = vsub.f32 %v329_v43, %v345_v49  ;;  %v348_v57 = vmul.f32 2.0, %v778_v53 }
  0xdc   :  { %v419_v62 = vmul.f32 1.442695, %v398_v51  ;;  %v397_v63 = vmul.f32 %v1057_v13, %v375_v52  ;;  %v278_v3 = vpop.f32.mrf.mxu0 }
  0xdd   :  { %v400_v4 = vmul.f32 %v1057_v13, %v378_v55  ;;  %v377_v5 = vmax.f32 %v361_v56, 0.0  ;;  %v364_v6 = vsub.f32 %v332_v50, %v348_v57  ;;  %v347_v58 = vmul.f32 2.0, %v278_v3 }
  0xde   :  { %852 = vpow2.f32 %v419_v62  ;;  %v417_v7 = vmul.f32 1.442695, %v397_v63  ;;  %v781_v8 = vpop.f32.mrf.mxu0 }
  0xdf   :  { %v423_v9 = vmul.f32 1.442695, %v400_v4  ;;  %v399_v10 = vmul.f32 %v1057_v13, %v377_v5  ;;  %v380_v11 = vmax.f32 %v364_v6, 0.0  ;;  %v363_v12 = vsub.f32 %v331_v54, %v347_v58  ;;  %v838_v4 = vld [vmem:[%s1225_s4 + $0x28] sm:$0xff]  }
  0xe0   :  { %854 = vpow2.f32 %v417_v7  ;;  %v350_v14 = vmul.f32 2.0, %v781_v8  ;;  %v288_v15 = vpop.f32.mrf.mxu0  ;;  %792 = vmatprep.subr.bf16.mxu0 %v838_v4  ;;  %822 = vmatprep.subr.bf16.mxu1 %v838_v4 }
  0xe1   :  { %856 = vpow2.f32 %v423_v9  ;;  %v421_v16 = vmul.f32 1.442695, %v399_v10  ;;  %v402_v17 = vmul.f32 %v1057_v13, %v380_v11  ;;  %v379_v18 = vmax.f32 %v363_v12, 0.0  ;;  %793 = vmatpush3.bf16.msra.mxu0 %v838_v4  ;;  %v839_v9 = vld [vmem:[%s1225_s4 + $0x20] sm:$0xff]   ;;  %830 = vmatpush3.bf16.msra.mxu1 %v838_v4  ;;  %v840_v10 = vld [vmem:[%s1225_s4 + $0x18] sm:$0xff]  }
  0xe2   :  { %v1078_v20 = vpop.eup %844  ;;  %v366_v23 = vsub.f32 %v334_v59, %v350_v14  ;;  %v349_v24 = vmul.f32 2.0, %v288_v15  ;;  %v784_v60 = vpop.f32.mrf.mxu0  ;;  %794 = vmatprep.subr.bf16.mxu0 %v839_v9  ;;  %823 = vmatprep.subr.bf16.mxu1 %v839_v9  ;;  %v841_v14 = vld [vmem:[%s1225_s4 + $0x10] sm:$0xff]  }
  0xe3   :  { %858 = vpow2.f32 %v421_v16  ;;  %v427_v25 = vmul.f32 1.442695, %v402_v17  ;;  %v401_v26 = vmul.f32 %v1057_v13, %v379_v18  ;;  %v352_v27 = vmul.f32 2.0, %v784_v60  ;;  %443 = vadd.xlane.f32.xlu1 %v1078_v20  ;;  %v842_v17 = vld [vmem:[%s1225_s4 + $0x8] sm:$0xff]  }
  0xe4   :  { %v1086_v29 = vpop.eup %846  ;;  %v382_v61 = vmax.f32 %v366_v23, 0.0  ;;  %v365_v31 = vsub.f32 %v333_v21, %v349_v24  ;;  %v298_v32 = vpop.f32.mrf.mxu0 }
  0xe5   :  { %860 = vpow2.f32 %v427_v25  ;;  %v425_v33 = vmul.f32 1.442695, %v401_v26  ;;  %v368_v34 = vsub.f32 %v336_v22, %v352_v27  ;;  %v351_v35 = vmul.f32 2.0, %v298_v32  ;;  %441 = vadd.xlane.f32.xlu0 %v1086_v29  ;;  %795 = vmatpush3.bf16.msra.mxu0 %v839_v9 }
  0xe6   :  { %v1092_v36 = vpop.eup %848  ;;  %v404_v37 = vmul.f32 %v1057_v13, %v382_v61  ;;  %v381_v38 = vmax.f32 %v365_v31, 0.0  ;;  %v787_v39 = vpop.f32.mrf.mxu0  ;;  %831 = vmatpush3.bf16.msra.mxu1 %v839_v9  ;;  %796 = vmatprep.subr.bf16.mxu0 %v840_v10 }
  0xe7   :  { %862 = vpow2.f32 %v425_v33  ;;  %v384_v1 = vmax.f32 %v368_v34, 0.0  ;;  %v367_v41 = vsub.f32 %v335_v30, %v351_v35  ;;  %v354_v42 = vmul.f32 2.0, %v787_v39  ;;  %447 = vadd.xlane.f32.xlu1 %v1092_v36  ;;  %824 = vmatprep.subr.bf16.mxu1 %v840_v10 }
  0xe8   :  { %v1097_v43 = vpop.eup %850  ;;  %v431_v44 = vmul.f32 1.442695, %v404_v37  ;;  %v403_v45 = vmul.f32 %v1057_v13, %v381_v38  ;;  %v308_v46 = vpop.f32.mrf.mxu0 }
  0xe9   :  { %v406_v47 = vmul.f32 %v1057_v13, %v384_v1  ;;  %v383_v48 = vmax.f32 %v367_v41, 0.0  ;;  %v370_v49 = vsub.f32 %v338_v0, %v354_v42  ;;  %v353_v50 = vmul.f32 2.0, %v308_v46  ;;  %445 = vadd.xlane.f32.xlu0 %v1097_v43  ;;  %797 = vmatpush3.bf16.msra.mxu0 %v840_v10 }
  0xea   :  { %864 = vpow2.f32 %v431_v44  ;;  %v429_v2 = vmul.f32 1.442695, %v403_v45  ;;  %832 = vmatpush3.bf16.msra.mxu1 %v840_v10  ;;  %798 = vmatprep.subr.bf16.mxu0 %v841_v14 }
  0xeb   :  { %v1102_v51 = vpop.eup %852  ;;  %v435_v52 = vmul.f32 1.442695, %v406_v47  ;;  %v405_v53 = vmul.f32 %v1057_v13, %v383_v48  ;;  %v386_v55 = vmax.f32 %v370_v49, 0.0  ;;  %v369_v56 = vsub.f32 %v337_v40, %v353_v50  ;;  %825 = vmatprep.subr.bf16.mxu1 %v841_v14 }
  0xec   :  { %866 = vpow2.f32 %v429_v2  ;;  %451 = vadd.xlane.f32.xlu1 %v1102_v51 }
  0xed   :  { %v1106_v57 = vpop.eup %854  ;;  %868 = vpow2.f32 %v435_v52  ;;  %v433_v54 = vmul.f32 1.442695, %v405_v53  ;;  %v408_v62 = vmul.f32 %v1057_v13, %v386_v55  ;;  %v385_v63 = vmax.f32 %v369_v56, 0.0  ;;  %799 = vmatpush3.bf16.msra.mxu0 %v841_v14 }
  0xee   :  { %v1109_v3 = vpop.eup %856  ;;  %449 = vadd.xlane.f32.xlu0 %v1106_v57  ;;  %833 = vmatpush3.bf16.msra.mxu1 %v841_v14 }
  0xef   :  { %870 = vpow2.f32 %v433_v54  ;;  %v439_v5 = vmul.f32 1.442695, %v408_v62  ;;  %v407_v6 = vmul.f32 %v1057_v13, %v385_v63  ;;  %800 = vmatprep.subr.bf16.mxu0 %v842_v17  ;;  %826 = vmatprep.subr.bf16.mxu1 %v842_v17 }
  0xf0   :  { %v1116_v58 = vpop.eup %858  ;;  %455 = vadd.xlane.f32.xlu1 %v1109_v3 }
  0xf1   :  { %872 = vpow2.f32 %v439_v5  ;;  %v437_v7 = vmul.f32 1.442695, %v407_v6  ;;  %801 = vmatpush3.bf16.msra.mxu0 %v842_v17 }
  0xf2   :  { %v1119_v8 = vpop.eup %860  ;;  %453 = vadd.xlane.f32.xlu0 %v1116_v58  ;;  %834 = vmatpush3.bf16.msra.mxu1 %v842_v17 }
  0xf3   :  { %874 = vpow2.f32 %v437_v7  ;;  %802 = vmatprep.subr.bf16.mxu0 %v843_v19  ;;  %827 = vmatprep.subr.bf16.mxu1 %v843_v19 }
  0xf4   :  { %v1125_v13 = vpop.eup %862  ;;  %459 = vadd.xlane.f32.xlu1 %v1119_v8 }
  0xf5   :  { %803 = vmatpush3.bf16.msra.mxu0 %v843_v19 }
  0xf6   :  { %457 = vadd.xlane.f32.xlu0 %v1125_v13  ;;  %835 = vmatpush3.bf16.msra.mxu1 %v843_v19 }
  0xf7   :  { %v1132_v11 = vpop.eup %864 }
  0xf8   :  { %463 = vadd.xlane.f32.xlu1 %v1132_v11 }
  0xf9   :  { %v1135_v12 = vpop.eup %866 }
  0xfa   :  { %v1137_v59 = vpop.eup %868  ;;  %461 = vadd.xlane.f32.xlu0 %v1135_v12 }
  0xfc   :  { %v1143_v15 = vpop.eup %870  ;;  %467 = vadd.xlane.f32.xlu1 %v1137_v59 }
  0xfe   :  { %v1146_v16 = vpop.eup %872  ;;  %465 = vadd.xlane.f32.xlu0 %v1143_v15 }
 0x100   :  { %v1152_v18 = vpop.eup %874  ;;  %471 = vadd.xlane.f32.xlu1 %v1146_v16 }
 0x102   :  { %469 = vadd.xlane.f32.xlu0 %v1152_v18 }
 0x16c   :  { %v444_v21 = vpop.xlane.xlu1 %443 }
 0x16d   :  { %v474_v22 = vadd.f32 1e-09, %v444_v21 }
 0x16e   :  { %v442_v23 = vpop.xlane.xlu0 %441 }
 0x16f   :  { %876 = vrcp.f32 %v474_v22  ;;  %v473_v24 = vadd.f32 1e-09, %v442_v23 }
 0x170   :  { %v448_v60 = vpop.xlane.xlu1 %447 }
 0x171   :  { %878 = vrcp.f32 %v473_v24  ;;  %v476_v25 = vadd.f32 1e-09, %v448_v60 }
 0x172   :  { %v446_v26 = vpop.xlane.xlu0 %445 }
 0x173   :  { %880 = vrcp.f32 %v476_v25  ;;  %v475_v27 = vadd.f32 1e-09, %v446_v26 }
 0x175   :  { %882 = vrcp.f32 %v475_v27  ;;  %v452_v28 = vpop.xlane.xlu1 %451 }
 0x176   :  { %v478_v30 = vadd.f32 1e-09, %v452_v28 }
 0x177   :  { %v450_v61 = vpop.xlane.xlu0 %449 }
 0x178   :  { %884 = vrcp.f32 %v478_v30  ;;  %v477_v31 = vadd.f32 1e-09, %v450_v61 }
 0x179   :  { %v456_v32 = vpop.xlane.xlu1 %455 }
 0x17a   :  { %886 = vrcp.f32 %v477_v31  ;;  %v480_v0 = vadd.f32 1e-09, %v456_v32 }
 0x17b   :  { %v454_v33 = vpop.xlane.xlu0 %453 }
 0x17c   :  { %v877_v34 = vpop.eup %876  ;;  %888 = vrcp.f32 %v480_v0  ;;  %v479_v35 = vadd.f32 1e-09, %v454_v33 }
 0x17d   :  { %v460_v37 = vpop.xlane.xlu1 %459  ;;  %v506_v41 = vmul.f32 %v877_v34, %v1078_v20 }
 0x17e   :  { %v879_v38 = vpop.eup %878  ;;  %890 = vrcp.f32 %v479_v35  ;;  %v482_v39 = vadd.f32 1e-09, %v460_v37 }
 0x17f   :  { %v458_v40 = vpop.xlane.xlu0 %457  ;;  %v505_v1 = vmul.f32 %v879_v38, %v1086_v29 }
 0x180   :  { %v881_v42 = vpop.eup %880  ;;  %892 = vrcp.f32 %v482_v39  ;;  %v481_v44 = vadd.f32 1e-09, %v458_v40 }
 0x181   :  { %v464_v45 = vpop.xlane.xlu1 %463  ;;  %v521_v46 = vpack.c.bf16 %v506_v41, %v505_v1  ;;  %v508_v2 = vmul.f32 %v881_v42, %v1092_v36 }
 0x182   :  { %v883_v47 = vpop.eup %882  ;;  %894 = vrcp.f32 %v481_v44  ;;  %v484_v48 = vadd.f32 1e-09, %v464_v45 }
 0x183   :  { %v462_v49 = vpop.xlane.xlu0 %461  ;;  %804 = vmatprep.mubr.bf16.mxu0 %v521_v46  ;;  %v507_v50 = vmul.f32 %v883_v47, %v1097_v43 }
 0x184   :  { %896 = vrcp.f32 %v484_v48  ;;  %v483_v52 = vadd.f32 1e-09, %v462_v49 }
 0x185   :  { %v885_v53 = vpop.eup %884  ;;  %v468_v29 = vpop.xlane.xlu1 %467  ;;  %v522_v55 = vpack.c.bf16 %v508_v2, %v507_v50 }
 0x186   :  { %898 = vrcp.f32 %v483_v52  ;;  %v486_v20 = vadd.f32 1e-09, %v468_v29  ;;  %v510_v4 = vmul.f32 %v885_v53, %v1102_v51 }
 0x187   :  { %v887_v56 = vpop.eup %886  ;;  %v466_v54 = vpop.xlane.xlu0 %465  ;;  %805 = vmatmul.mubr.bf16.vlgmr.msra.gmra.mxu0 %v522_v55 }
 0x188   :  { %900 = vrcp.f32 %v486_v20  ;;  %v485_v62 = vadd.f32 1e-09, %v466_v54  ;;  %v509_v63 = vmul.f32 %v887_v56, %v1106_v57 }
 0x189   :  { %v889_v5 = vpop.eup %888  ;;  %v472_v43 = vpop.xlane.xlu1 %471 }
 0x18a   :  { %902 = vrcp.f32 %v485_v62  ;;  %v488_v36 = vadd.f32 1e-09, %v472_v43  ;;  %v523_v6 = vpack.c.bf16 %v510_v4, %v509_v63  ;;  %v512_v17 = vmul.f32 %v889_v5, %v1109_v3 }
 0x18b   :  { %v891_v7 = vpop.eup %890  ;;  %v470_v9 = vpop.xlane.xlu0 %469 }
 0x18c   :  { %904 = vrcp.f32 %v488_v36  ;;  %v487_v10 = vadd.f32 1e-09, %v470_v9  ;;  %808 = vmatprep.mubr.bf16.mxu1 %v523_v6  ;;  %v511_v14 = vmul.f32 %v891_v7, %v1116_v58 }
 0x18d   :  { %v893_v19 = vpop.eup %892 }
 0x18e   :  { %906 = vrcp.f32 %v487_v10  ;;  %v524_v21 = vpack.c.bf16 %v512_v17, %v511_v14  ;;  %v514_v22 = vmul.f32 %v893_v19, %v1119_v8 }
 0x18f   :  { %v895_v57 = vpop.eup %894 }
 0x190   :  { %809 = vmatmul.mubr.bf16.vlgmr.msra.gmra.mxu1 %v524_v21  ;;  %v513_v51 = vmul.f32 %v895_v57, %v1125_v13 }
 0x191   :  { %v897_v23 = vpop.eup %896 }
 0x192   :  { %v525_v24 = vpack.c.bf16 %v514_v22, %v513_v51  ;;  %v516_v26 = vmul.f32 %v897_v23, %v1132_v11 }
 0x193   :  { %v899_v60 = vpop.eup %898 }
 0x194   :  { %812 = vmatprep.mubr.bf16.mxu1 %v525_v24  ;;  %v515_v25 = vmul.f32 %v899_v60, %v1135_v12 }
 0x195   :  { %v901_v58 = vpop.eup %900 }
 0x196   :  { %v526_v27 = vpack.c.bf16 %v516_v26, %v515_v25  ;;  %v518_v30 = vmul.f32 %v901_v58, %v1137_v59 }
 0x197   :  { %v903_v3 = vpop.eup %902 }
 0x198   :  { %813 = vmatmul.mubr.bf16.gmra.mxu1 %v526_v27  ;;  %v517_v28 = vmul.f32 %v903_v3, %v1143_v15 }
 0x199   :  { %v905_v61 = vpop.eup %904 }
 0x19a   :  { %v527_v13 = vpack.c.bf16 %v518_v30, %v517_v28  ;;  %v520_v32 = vmul.f32 %v905_v61, %v1146_v16 }
 0x19b   :  { %v907_v31 = vpop.eup %906 }
 0x19c   :  { %816 = vmatprep.mubr.bf16.mxu1 %v527_v13  ;;  %v519_v8 = vmul.f32 %v907_v31, %v1152_v18 }
 0x19e   :  { %v528_v0 = vpack.c.bf16 %v520_v32, %v519_v8 }
 0x1a0   :  { %817 = vmatmul.mubr.bf16.gmra.mxu1 %v528_v0 }
 0x247   :  { %v806_v12 = vpop.f32.mrf.mxu0 }
 0x248   :  { %676 = vst [vmem:[%s1228_s5 + $0x10] sm:$0xff] %v806_v12 }
 0x249   :  { %v611_v11 = vpop.f32.mrf.mxu0 }
 0x24a   :  { %674 = vst [vmem:[%s1228_s5] sm:$0xff] %v611_v11 }
 0x24b   :  { %v807_v59 = vpop.f32.mrf.mxu0 }
 0x24c   :  { %677 = vst [vmem:[%s1228_s5 + $0x18] sm:$0xff] %v807_v59 }
 0x24d   :  { %v614_v15 = vpop.f32.mrf.mxu0 }
 0x24e   :  { %675 = vst [vmem:[%s1228_s5 + $0x8] sm:$0xff] %v614_v15 }
 0x250   :  { %v810_v16 = vpop.f32.mrf.mxu1 }
 0x251   :  { %680 = vst [vmem:[%s1228_s5 + $0x30] sm:$0xff] %v810_v16 }
 0x252   :  { %v627_v18 = vpop.f32.mrf.mxu1 }
 0x253   :  { %678 = vst [vmem:[%s1228_s5 + $0x20] sm:$0xff] %v627_v18 }
 0x254   :  { %v811_v33 = vpop.f32.mrf.mxu1 }
 0x255   :  { %681 = vst [vmem:[%s1228_s5 + $0x38] sm:$0xff] %v811_v33 }
 0x256   :  { %v630_v34 = vpop.f32.mrf.mxu1 }
 0x257   :  { %679 = vst [vmem:[%s1228_s5 + $0x28] sm:$0xff] %v630_v34 }
 0x258   :  { %v814_v35 = vpop.f32.mrf.mxu1 }
 0x259   :  { %684 = vst [vmem:[%s1228_s5 + $0x50] sm:$0xff] %v814_v35 }
 0x25a   :  { %v643_v37 = vpop.f32.mrf.mxu1 }
 0x25b   :  { %682 = vst [vmem:[%s1228_s5 + $0x40] sm:$0xff] %v643_v37 }
 0x25c   :  { %v815_v38 = vpop.f32.mrf.mxu1 }
 0x25d   :  { %685 = vst [vmem:[%s1228_s5 + $0x58] sm:$0xff] %v815_v38 }
 0x25e   :  { %v646_v39 = vpop.f32.mrf.mxu1 }
 0x25f   :  { %683 = vst [vmem:[%s1228_s5 + $0x48] sm:$0xff] %v646_v39 }
 0x260   :  { %v818_v40 = vpop.f32.mrf.mxu1 }
 0x261   :  { %688 = vst [vmem:[%s1228_s5 + $0x70] sm:$0xff] %v818_v40 }
 0x262   :  { %v659_v1 = vpop.f32.mrf.mxu1 }
 0x263   :  { %686 = vst [vmem:[%s1228_s5 + $0x60] sm:$0xff] %v659_v1 }
 0x264   :  { %v819_v41 = vpop.f32.mrf.mxu1 }
 0x265   :  { %689 = vst [vmem:[%s1228_s5 + $0x78] sm:$0xff] %v819_v41 }
 0x266   :  { %v662_v42 = vpop.f32.mrf.mxu1 }
 0x267   :  { %687 = vst [vmem:[%s1228_s5 + $0x68] sm:$0xff] %v662_v42 }

</bundles_post_ra>
